<compile_context>
chip_gen: v7x
topology: tpu7x:2x2x1
jax: 0.10.0
libtpu: 0.0.40
codegen_flags: <defaults>
</compile_context>

<pallas_src>
import functools
import math

import jax
import jax.numpy as jnp
import numpy as np
from jax.experimental import pallas as pl
from jax.experimental.pallas import tpu as pltpu


# --------------------------------------------------------------------------
# Kernel 1: fused projection  z @ [u_a | w_a]  (+ bias folded into `left`)
# --------------------------------------------------------------------------
def _proj_kernel(z_ref, w_ref, b_ref, left_ref, right_ref):
    """One (batch, row-tile) block.

    z_ref     : (1, Tp, D)  f32
    w_ref     : (D, 2H)     f32   concat(u_a, w_a) along the output dim
    b_ref     : (1, H)      f32   b_s
    left_ref  : (1, Tp, H)  f32   z @ u_a + b_s   (bias folded once, O(S*H))
    right_ref : (1, Tp, H)  f32   z @ w_a
    """
    z = z_ref[0]                                                      # (Tp, D)
    lr = jnp.dot(z, w_ref[...], preferred_element_type=jnp.float32)   # (Tp, 2H)
    h = left_ref.shape[-1]
    left_ref[0] = lr[:, :h] + b_ref[...]
    right_ref[0] = lr[:, h:2 * h]


# --------------------------------------------------------------------------
# Kernel 2: pairwise scoring over one (i-tile, j-tile) of the S x S plane
# --------------------------------------------------------------------------
def _replicate_lanes(x, reps):
    """Concat `reps` copies of x along the lane axis.

    When the row width divides 128 we build a 128-lane unit first so the
    second-stage concatenation operates on full, aligned vregs.
    """
    if reps == 1:
        return x
    h = x.shape[-1]
    if h < 128 and 128 % h == 0 and (reps * h) % 128 == 0:
        x = jnp.concatenate([x] * (128 // h), axis=-1)        # (..., 128)
        reps = (reps * h) // 128
        if reps == 1:
            return x
    return jnp.concatenate([x] * reps, axis=-1)


def _pairwise_rel_kernel(left_ref, rightd_ref, vbig_ref, out_ref, *, tj, act_fn):
    """One (batch, i-tile, j-tile) block.

    left_ref  : (1, Ti, H)          f32   u_a rows (b_s already folded in)
    rightd_ref: (1, 1, 1, Tj*H)     f32   w_a rows of the j-tile, lane-flattened
    vbig_ref  : (Tj*H, Tj*R)        bf16  block-diagonal kron(I_Tj, v)
    out_ref   : (1, Ti, Tj*R)             lane-dense 0/1 predictions
    """
    l = left_ref[0]                            # (Ti, H) f32
    rd = rightd_ref[0, 0]                      # (1, Tj*H) f32
    l_rep = _replicate_lanes(l, tj)            # (Ti, Tj*H), lane-dense
    act = act_fn(l_rep + rd)                   # f32 elementwise, dense lanes
    # One fused MXU matmul per grid step; bf16 operands, f32 accumulation.
    g = jnp.dot(act.astype(jnp.bfloat16), vbig_ref[...],
                preferred_element_type=jnp.float32)            # (Ti, Tj*R)
    # round(sigmoid(g)) == (g > 0): sigmoid(0)=0.5 rounds half-to-even to 0.
    out_ref[0] = (g > 0).astype(out_ref.dtype)                 # single dense store


# --------------------------------------------------------------------------
# Host-side wrapper
# --------------------------------------------------------------------------
def _round_up(x, m):
    return ((x + m - 1) // m) * m


@functools.partial(jax.jit,
                   static_argnames=("ti", "tj", "out_dtype", "activation"))
def multihead_forward(lstm_output, pred_ner, params, *, ti=512, tj=32,
                      out_dtype=jnp.float32, activation="tanh"):
    """MultiHeadLayers.forward (predictedRel) with the heavy math in Pallas.

    ti / tj : requested S x S plane tile sizes.  They are rounded/clamped so
      that (tj * rel_size) is a multiple of 128 (lane-dense output blocks) and
      ti satisfies the sublane rule for `out_dtype`.  S is padded to a
      layout-friendly multiple and the result trimmed.  Per-step VMEM use is
      a few MiB even at the defaults, so these tiles are safe on v5e/v6e
      (128 MiB) and v7x (64 MiB).
    out_dtype : float32 (default, exact torch parity: float 0/1 tensor) or
      int8/bool — 4x less HBM writeback on the dominant (B, S, S*R) output.
    """
    u_a = params["u_a"]
    w_a = params["w_a"]
    v = params["v"]
    b_s = params["b_s"]
    emb = params.get("label_embedding")

    b, s, _ = lstm_output.shape
    h = u_a.shape[1]
    r = v.shape[1]

    if activation == "tanh":
        act_fn = jnp.tanh
    elif activation == "relu":
        act_fn = lambda x: jnp.maximum(x, jnp.float32(0.0))
    else:
        raise ValueError(f"unsupported activation: {activation}")

    # Embedding gather + concat is cheap glue (dropout = identity, eval mode).
    if emb is not None and emb.shape[1] > 0:
        z = jnp.concatenate([lstm_output, jnp.take(emb, pred_ner, axis=0)],
                            axis=2)
    else:
        z = lstm_output
    z = z.astype(jnp.float32)
    d = z.shape[2]

    # ---- tile selection + padding (layout-safe on every TPU generation) ---
    out_bytes = np.dtype(out_dtype).itemsize
    sub_min = max(8, 32 // out_bytes)                 # 8 f32, 16 bf16, 32 int8
    tj_unit = math.lcm(8, 128 // math.gcd(r, 128))    # guarantees (tj*r)%128==0
    tj_eff = max(tj_unit, (max(1, min(tj, 512)) // tj_unit) * tj_unit)
    tj_eff = min(tj_eff, max(tj_unit, 64))            # bound kron(I,v) / unrolls
    s_pad = _round_up(s, math.lcm(tj_eff, sub_min))
    ti_eff = sub_min
    start = max(sub_min, (min(max(ti, sub_min), s_pad) // sub_min) * sub_min)
    for t in range(start, sub_min - 1, -sub_min):
        if s_pad % t == 0:
            ti_eff = t
            break
    tp = s_pad if s_pad <= 2048 else ti_eff           # projection row tile

    if s_pad != s:
        z = jnp.pad(z, ((0, 0), (0, s_pad - s), (0, 0)))

    # Fused projection weight: one (D, 2H) matmul instead of two (D, H) ones.
    w_fused = jnp.concatenate([u_a, w_a], axis=1).astype(jnp.float32)  # (D, 2H)
    b_2d = b_s.reshape(1, h).astype(jnp.float32)

    # ---- 1) projections, hoisted out of the S x S tiling -------------------
    left, right = pl.pallas_call(
        _proj_kernel,
        out_shape=(jax.ShapeDtypeStruct((b, s_pad, h), jnp.float32),
                   jax.ShapeDtypeStruct((b, s_pad, h), jnp.float32)),
        grid_spec=pltpu.PrefetchScalarGridSpec(
            num_scalar_prefetch=0,
            grid=(b, s_pad // tp),
            in_specs=[
                pl.BlockSpec((1, tp, d), lambda bb, ii: (bb, ii, 0)),
                pl.BlockSpec((d, 2 * h), lambda bb, ii: (0, 0)),
                pl.BlockSpec((1, h), lambda bb, ii: (0, 0)),
            ],
            out_specs=(
                pl.BlockSpec((1, tp, h), lambda bb, ii: (bb, ii, 0)),
                pl.BlockSpec((1, tp, h), lambda bb, ii: (bb, ii, 0)),
            )),
        compiler_params=pltpu.CompilerParams(
            dimension_semantics=("parallel", "parallel")),
    )(z, w_fused, b_2d)

    # ---- 2) tiled pairwise scoring, lane-dense (B, S, S*R) output ----------
    # Free, contiguous HBM view: each j-tile of `right` becomes one (1, Tj*H)
    # lane-flattened row, so the kernel never assembles it.
    right_dense = right.reshape(b, s_pad // tj_eff, 1, tj_eff * h)
    # Block-diagonal weight so one matmul yields the (Ti, Tj*R) block directly.
    v_big = jnp.kron(jnp.eye(tj_eff, dtype=jnp.float32),
                     v.astype(jnp.float32)).astype(jnp.bfloat16)

    kernel = functools.partial(_pairwise_rel_kernel, tj=tj_eff, act_fn=act_fn)
    out = pl.pallas_call(
        kernel,
        out_shape=jax.ShapeDtypeStruct((b, s_pad, s_pad * r), out_dtype),
        grid_spec=pltpu.PrefetchScalarGridSpec(
            num_scalar_prefetch=0,
            grid=(b, s_pad // ti_eff, s_pad // tj_eff),
            in_specs=[
                pl.BlockSpec((1, ti_eff, h), lambda bb, i, j: (bb, i, 0)),
                pl.BlockSpec((1, 1, 1, tj_eff * h),
                             lambda bb, i, j: (bb, j, 0, 0)),
                pl.BlockSpec((tj_eff * h, tj_eff * r),
                             lambda bb, i, j: (0, 0)),
            ],
            out_specs=pl.BlockSpec((1, ti_eff, tj_eff * r),
                                   lambda bb, i, j: (bb, i, j))),
        compiler_params=pltpu.CompilerParams(
            dimension_semantics=("parallel", "parallel", "parallel"),
            vmem_limit_bytes=32 * 1024 * 1024),
    )(left, right_dense, v_big)

    # Trim padding (rows are cheap; columns need a reshape-slice-reshape).
    if s_pad != s:
        out = out[:, :s, :].reshape(b, s, s_pad, r)
        out = out[:, :, :s, :].reshape(b, s, s * r)
    return out


def bert_bilstm_crf_forward(lstm_output, pred_ner, params, **kwargs):
    """BertBiLSTMCRF.forward with use_extra=True.

    The encoder / CRF decoder are not part of the provided source; their
    outputs (lstm_output, pred_ner) are taken as inputs.
    Returns (predictedNer, predictedRel).
    """
    predicted_ner = pred_ner  # placeholder for CRFDecoder output (see TODO above)
    predicted_rel = multihead_forward(lstm_output, pred_ner, params, **kwargs)
    return predicted_ner, predicted_rel


# --------------------------------------------------------------------------
# Pure-JAX reference (same op order as the torch module)
# --------------------------------------------------------------------------
def _reference_logits(lstm_output, pred_ner, params):
    hi = jax.lax.Precision.HIGHEST
    emb = jnp.take(params["label_embedding"], pred_ner, axis=0)
    z = jnp.concatenate([lstm_output, emb], axis=2)
    left = jnp.einsum("aij,jk->aik", z, params["u_a"], precision=hi)
    right = jnp.einsum("aij,jk->aik", z, params["w_a"], precision=hi)
    outer = left[:, :, None, :] + right[:, None, :, :] + params["b_s"]
    act = jnp.tanh(outer)
    g = jnp.einsum("aijk,kp->aijp", act, params["v"], precision=hi)
    bb, ss, _, rr = g.shape
    return g.reshape(bb, ss, ss * rr)


if __name__ == "__main__":
    # Small shapes consistent with the module.
    B, S = 2, 16
    LSTM_HIDDEN = 32           # lstm_hidden_size (encoder output dim)
    LABEL_EMB = 16             # label_embedding_size
    HIDDEN = 32                # hidden_size
    NER_SIZE = 8
    REL_SIZE = 16              # rel_size

    key = jax.random.PRNGKey(0)
    k_lstm, k_ner, k_ua, k_wa, k_v, k_bs, k_emb = jax.random.split(key, 7)

    lstm_output = jax.random.normal(k_lstm, (B, S, LSTM_HIDDEN), dtype=jnp.float32)
    pred_ner = jax.random.randint(k_ner, (B, S), 0, NER_SIZE, dtype=jnp.int32)

    D = LSTM_HIDDEN + LABEL_EMB
    params = {
        "u_a": jax.random.normal(k_ua, (D, HIDDEN), dtype=jnp.float32),
        "w_a": jax.random.normal(k_wa, (D, HIDDEN), dtype=jnp.float32),
        "v": jax.random.normal(k_v, (HIDDEN, REL_SIZE), dtype=jnp.float32),
        "b_s": jax.random.normal(k_bs, (HIDDEN,), dtype=jnp.float32),
        "label_embedding": jax.random.normal(
            k_emb, (NER_SIZE, LABEL_EMB), dtype=jnp.float32),
    }

    # Reference logits (f32, HIGHEST precision) and its thresholded prediction.
    g_ref = jax.block_until_ready(_reference_logits(lstm_output, pred_ner, params))
    g_np = np.asarray(g_ref)
    ref_pred = np.asarray(jnp.round(jax.nn.sigmoid(g_ref)))
    # Allowed mismatch band: only bf16-at-the-MXU rounding differs from the
    # reference, which can flip decisions only very close to the boundary.
    band = np.abs(g_np) <= 0.5

    # 1) Small tiles -> genuinely tiled grid (B=2, 2 i-tiles, 2 j-tiles),
    #    no padding, float32 output (exact torch dtype parity).
    predicted_ner, predicted_rel = bert_bilstm_crf_forward(
        lstm_output, pred_ner, params, ti=8, tj=8)
    predicted_rel = jax.block_until_ready(predicted_rel)
    assert predicted_rel.shape == (B, S, S * REL_SIZE), predicted_rel.shape
    pred_np = np.asarray(predicted_rel)
    ok = (pred_np == ref_pred) | band
    assert bool(ok.all()), f"{int((~ok).sum())} mismatching predictions (f32 path)"
    assert set(np.unique(pred_np)).issubset({0.0, 1.0})

    # 2) Default (large) tiles + int8 output: exercises the pad/trim path
    #    (S=16 is padded to 32) and the low-writeback output dtype.
    rel_i8 = multihead_forward(lstm_output, pred_ner, params,
                               out_dtype=jnp.int8)
    rel_i8 = np.asarray(jax.block_until_ready(rel_i8))
    assert rel_i8.shape == (B, S, S * REL_SIZE), rel_i8.shape
    assert rel_i8.dtype == np.int8
    ok2 = (rel_i8.astype(np.float32) == ref_pred) | band
    assert bool(ok2.all()), f"{int((~ok2).sum())} mismatching predictions (int8 path)"
    assert set(np.unique(rel_i8)).issubset({0, 1})

    print("KERNEL_OK")
</pallas_src>

<mosaic_0001>
module attributes {stable_mosaic.version = 11 : i64} {
  func.func @_proj_kernel(%arg0: i32, %arg1: i32, %arg2: memref<1x16x48xf32, #tpu.memory_space<vmem>>, %arg3: memref<48x64xf32, #tpu.memory_space<vmem>>, %arg4: memref<1x32xf32, #tpu.memory_space<vmem>>, %arg5: memref<1x16x32xf32, #tpu.memory_space<vmem>>, %arg6: memref<1x16x32xf32, #tpu.memory_space<vmem>>) attributes {dimension_semantics = [#tpu.dimension_semantics<parallel>, #tpu.dimension_semantics<parallel>], iteration_bounds = array<i64: 2, 1>, scalar_prefetch = 0 : i64, scratch_operands = 0 : i64, tpu.core_type = #tpu.core_type<tc>, window_params = [{transform_indices = @transform_0, window_bounds = array<i64: 1, 16, 48>}, {pipeline_mode = #tpu.pipeline_mode<synchronous>, transform_indices = @transform_1, window_bounds = array<i64: 48, 64>}, {pipeline_mode = #tpu.pipeline_mode<synchronous>, transform_indices = @transform_2, window_bounds = array<i64: 1, 32>}, {transform_indices = @transform_3, window_bounds = array<i64: 1, 16, 32>}, {transform_indices = @transform_4, window_bounds = array<i64: 1, 16, 32>}]} {
    %c0 = arith.constant 0 : index
    %c0_0 = arith.constant 0 : index
    %c0_1 = arith.constant 0 : index
    %0 = vector.load %arg2[%c0, %c0_0, %c0_1] : memref<1x16x48xf32, #tpu.memory_space<vmem>>, vector<1x16x48xf32>
    %1 = vector.shape_cast %0 : vector<1x16x48xf32> to vector<16x48xf32>
    %c0_2 = arith.constant 0 : index
    %c0_3 = arith.constant 0 : index
    %2 = vector.load %arg3[%c0_2, %c0_3] : memref<48x64xf32, #tpu.memory_space<vmem>>, vector<48x64xf32>
    %cst = arith.constant dense<0.000000e+00> : vector<16x64xf32>
    %3 = tpu.matmul %1, %2, %cst {dimension_numbers = #tpu.dot_dimension_numbers<[1], [0], [0], [1], [0, 0, 1, 1], [], []>} : vector<16x48xf32>, vector<48x64xf32>, vector<16x64xf32> -> vector<16x64xf32>
    %4 = vector.extract_strided_slice %3 {offsets = [0, 0], sizes = [16, 32], strides = [1, 1]} : vector<16x64xf32> to vector<16x32xf32>
    %c0_4 = arith.constant 0 : index
    %c0_5 = arith.constant 0 : index
    %5 = vector.load %arg4[%c0_4, %c0_5] : memref<1x32xf32, #tpu.memory_space<vmem>>, vector<1x32xf32>
    %6 = vector.broadcast %5 : vector<1x32xf32> to vector<16x32xf32>
    %7 = arith.addf %4, %6 : vector<16x32xf32>
    %c0_6 = arith.constant 0 : index
    %c0_7 = arith.constant 0 : index
    %c0_8 = arith.constant 0 : index
    %8 = vector.load %arg5[%c0_6, %c0_7, %c0_8] : memref<1x16x32xf32, #tpu.memory_space<vmem>>, vector<1x16x32xf32>
    %9 = vector.shape_cast %8 : vector<1x16x32xf32> to vector<16x32xf32>
    %10 = vector.shape_cast %7 : vector<16x32xf32> to vector<1x16x32xf32>
    tpu.vector_store %arg5[%c0_6, %c0_7, %c0_8], %10 {strides = array<i32>} : memref<1x16x32xf32, #tpu.memory_space<vmem>>, vector<1x16x32xf32>,
    %11 = vector.extract_strided_slice %3 {offsets = [0, 32], sizes = [16, 32], strides = [1, 1]} : vector<16x64xf32> to vector<16x32xf32>
    %c0_9 = arith.constant 0 : index
    %c0_10 = arith.constant 0 : index
    %c0_11 = arith.constant 0 : index
    %12 = vector.load %arg6[%c0_9, %c0_10, %c0_11] : memref<1x16x32xf32, #tpu.memory_space<vmem>>, vector<1x16x32xf32>
    %13 = vector.shape_cast %12 : vector<1x16x32xf32> to vector<16x32xf32>
    %14 = vector.shape_cast %11 : vector<16x32xf32> to vector<1x16x32xf32>
    tpu.vector_store %arg6[%c0_9, %c0_10, %c0_11], %14 {strides = array<i32>} : memref<1x16x32xf32, #tpu.memory_space<vmem>>, vector<1x16x32xf32>,
    return
  }
  func.func @transform_0(%arg0: i32, %arg1: i32) -> (i32, i32, i32) {
    %c0_i32 = arith.constant 0 : i32
    %c0_i32_0 = arith.constant 0 : i32
    return %arg0, %arg1, %c0_i32 : i32, i32, i32
  }
  func.func @transform_1(%arg0: i32, %arg1: i32) -> (i32, i32) {
    %c0_i32 = arith.constant 0 : i32
    %c0_i32_0 = arith.constant 0 : i32
    %c0_i32_1 = arith.constant 0 : i32
    return %c0_i32, %c0_i32_0 : i32, i32
  }
  func.func @transform_2(%arg0: i32, %arg1: i32) -> (i32, i32) {
    %c0_i32 = arith.constant 0 : i32
    %c0_i32_0 = arith.constant 0 : i32
    %c0_i32_1 = arith.constant 0 : i32
    return %c0_i32, %c0_i32_0 : i32, i32
  }
  func.func @transform_3(%arg0: i32, %arg1: i32) -> (i32, i32, i32) {
    %c0_i32 = arith.constant 0 : i32
    %c0_i32_0 = arith.constant 0 : i32
    return %arg0, %arg1, %c0_i32 : i32, i32, i32
  }
  func.func @transform_4(%arg0: i32, %arg1: i32) -> (i32, i32, i32) {
    %c0_i32 = arith.constant 0 : i32
    %c0_i32_0 = arith.constant 0 : i32
    return %arg0, %arg1, %c0_i32 : i32, i32, i32
  }
}

module attributes {stable_mosaic.version = 11 : i64} {
  func.func @_pairwise_rel_kernel(%arg0: i32, %arg1: i32, %arg2: i32, %arg3: memref<1x8x32xf32, #tpu.memory_space<vmem>>, %arg4: memref<1x1x1x256xf32, #tpu.memory_space<vmem>>, %arg5: memref<256x128xbf16, #tpu.memory_space<vmem>>, %arg6: memref<1x8x128xf32, #tpu.memory_space<vmem>>) attributes {dimension_semantics = [#tpu.dimension_semantics<parallel>, #tpu.dimension_semantics<parallel>, #tpu.dimension_semantics<parallel>], iteration_bounds = array<i64: 2, 2, 2>, scalar_prefetch = 0 : i64, scratch_operands = 0 : i64, tpu.core_type = #tpu.core_type<tc>, window_params = [{transform_indices = @transform_0, window_bounds = array<i64: 1, 8, 32>}, {transform_indices = @transform_1, window_bounds = array<i64: 1, 1, 1, 256>}, {pipeline_mode = #tpu.pipeline_mode<synchronous>, transform_indices = @transform_2, window_bounds = array<i64: 256, 128>}, {transform_indices = @transform_3, window_bounds = array<i64: 1, 8, 128>}]} {
    %c0 = arith.constant 0 : index
    %c0_0 = arith.constant 0 : index
    %c0_1 = arith.constant 0 : index
    %0 = vector.load %arg3[%c0, %c0_0, %c0_1] : memref<1x8x32xf32, #tpu.memory_space<vmem>>, vector<1x8x32xf32>
    %1 = vector.shape_cast %0 : vector<1x8x32xf32> to vector<8x32xf32>
    %c0_2 = arith.constant 0 : index
    %c0_3 = arith.constant 0 : index
    %c0_4 = arith.constant 0 : index
    %c0_5 = arith.constant 0 : index
    %2 = vector.load %arg4[%c0_2, %c0_3, %c0_4, %c0_5] : memref<1x1x1x256xf32, #tpu.memory_space<vmem>>, vector<1x1x1x256xf32>
    %3 = vector.shape_cast %2 : vector<1x1x1x256xf32> to vector<1x256xf32>
    %4 = tpu.concatenate %1, %1, %1, %1 in 1 : vector<8x32xf32>, vector<8x32xf32>, vector<8x32xf32>, vector<8x32xf32> -> vector<8x128xf32>
    %5 = tpu.concatenate %4, %4 in 1 : vector<8x128xf32>, vector<8x128xf32> -> vector<8x256xf32>
    %6 = vector.broadcast %3 : vector<1x256xf32> to vector<8x256xf32>
    %7 = arith.addf %5, %6 : vector<8x256xf32>
    %8 = math.tanh %7 : vector<8x256xf32>
    %9 = arith.truncf %8 : vector<8x256xf32> to vector<8x256xbf16>
    %c0_6 = arith.constant 0 : index
    %c0_7 = arith.constant 0 : index
    %10 = vector.load %arg5[%c0_6, %c0_7] : memref<256x128xbf16, #tpu.memory_space<vmem>>, vector<256x128xbf16>
    %cst = arith.constant dense<0.000000e+00> : vector<8x128xf32>
    %11 = tpu.matmul %9, %10, %cst {dimension_numbers = #tpu.dot_dimension_numbers<[1], [0], [0], [1], [0, 0, 1, 1], [], []>} : vector<8x256xbf16>, vector<256x128xbf16>, vector<8x128xf32> -> vector<8x128xf32>
    %cst_8 = arith.constant 0.000000e+00 : f32
    %12 = vector.broadcast %cst_8 : f32 to vector<8x128xf32>
    %13 = arith.cmpf ogt, %11, %12 : vector<8x128xf32>
    %14 = arith.extui %13 : vector<8x128xi1> to vector<8x128xi32>
    %15 = arith.sitofp %14 : vector<8x128xi32> to vector<8x128xf32>
    %c0_9 = arith.constant 0 : index
    %c0_10 = arith.constant 0 : index
    %c0_11 = arith.constant 0 : index
    %16 = vector.load %arg6[%c0_9, %c0_10, %c0_11] : memref<1x8x128xf32, #tpu.memory_space<vmem>>, vector<1x8x128xf32>
    %17 = vector.shape_cast %16 : vector<1x8x128xf32> to vector<8x128xf32>
    %18 = vector.shape_cast %15 : vector<8x128xf32> to vector<1x8x128xf32>
    tpu.vector_store %arg6[%c0_9, %c0_10, %c0_11], %18 {strides = array<i32>} : memref<1x8x128xf32, #tpu.memory_space<vmem>>, vector<1x8x128xf32>,
    return
  }
  func.func @transform_0(%arg0: i32, %arg1: i32, %arg2: i32) -> (i32, i32, i32) {
    %c0_i32 = arith.constant 0 : i32
    %c0_i32_0 = arith.constant 0 : i32
    return %arg0, %arg1, %c0_i32 : i32, i32, i32
  }
  func.func @transform_1(%arg0: i32, %arg1: i32, %arg2: i32) -> (i32, i32, i32, i32) {
    %c0_i32 = arith.constant 0 : i32
    %c0_i32_0 = arith.constant 0 : i32
    %c0_i32_1 = arith.constant 0 : i32
    return %arg0, %arg2, %c0_i32, %c0_i32_0 : i32, i32, i32, i32
  }
  func.func @transform_2(%arg0: i32, %arg1: i32, %arg2: i32) -> (i32, i32) {
    %c0_i32 = arith.constant 0 : i32
    %c0_i32_0 = arith.constant 0 : i32
    %c0_i32_1 = arith.constant 0 : i32
    return %c0_i32, %c0_i32_0 : i32, i32
  }
  func.func @transform_3(%arg0: i32, %arg1: i32, %arg2: i32) -> (i32, i32, i32) {
    %c0_i32 = arith.constant 0 : i32
    return %arg0, %arg1, %arg2 : i32, i32, i32
  }
}

</mosaic_0001>

<bundles_post_ra>
// kernel: multihead_forward.2
= control target key start
LH: loop header
LB: loop body
LE: loop exit
PB: predicated region body
PF: predicated region fallthrough
CT: control target
= control target key end

     0   :  { %s639_s15 = smov 0   ;;  %s641_s16 = smov 0   ;;  %s696_s0 = inlined_call_operand.vmem [shape: f32[2,16,48], index: 0, kind: input, shape index: {}]   ;;  %s697_s1 = inlined_call_operand.vmem [shape: f32[48,64], index: 1, kind: input, shape index: {}]   ;;  %s698_s2 = inlined_call_operand.vmem [shape: f32[1,32], index: 2, kind: input, shape index: {}]   ;;  %s699_s3 = inlined_call_operand.vmem [shape: f32[2,16,32], index: 3, kind: output, shape index: {0}]   ;;  %s700_s4 = inlined_call_operand.vmem [shape: f32[2,16,32], index: 4, kind: output, shape index: {1}]  }
   0x1   :  { %s643_s17 = smov 0  }
   0x2 LB: > { %s27_s18 = sadd.s32 1, %s607_s16  ;;  %p514_p0 = scmp.ge.s32.totalorder %s611_s17, 1  ;;  %s611_s17 = sphi %s643_s17, %s15_s17   ;;  %s607_s16 = sphi %s641_s16, %s702_s16   ;;  %s603_s15 = sphi %s639_s15, %s701_s15  }
   0x3   : > { %p29_p1 = scmp.ge.s32.totalorder %s27_s18, 2  ;;  %p188_p2 = scmp.lt.s32.totalorder %s611_s17, 3 }
   0x5   : > { %s704_s18 = smov (%p29_p1, %s27_s18), 0  ;;  %p189_p3 = pnand %p514_p0, %p188_p2 }
   0x6   : > { %v263_v0 = vld [vmem:[%s697_s1] sm:$0xff] (!%p189_p3)  ;;  %v264_v1 = vld [vmem:[%s697_s1 + $0x8] sm:$0xff] (!%p189_p3)  ;;  %v265_v2 = vld [vmem:[%s697_s1 + $0x10] sm:$0xff] (!%p189_p3)  ;;  %p232_p4 = scmp.lt.s32.totalorder (!%p189_p3), %s603_s15, 1  ;;  %vm269_vm0 = vcmask (!%p189_p3), 392192   ;;  %vm360_vm1 = vcmask (!%p189_p3), 261120  }
   0x7   : > { %192 = sbr.rel (%p189_p3) target bundleno = 354 (0x162), region = 32  ;;  %v552_v3 = vpack.c.bf16 (!%p189_p3), %v264_v1, %v263_v0  ;;  %v266_v4 = vld [vmem:[%s697_s1 + $0x18] sm:$0xff] (!%p189_p3)  ;;  %v267_v6 = vld [vmem:[%s697_s1 + $0x20] sm:$0xff] (!%p189_p3)  ;;  %v268_v7 = vld [vmem:[%s697_s1 + $0x28] sm:$0xff] (!%p189_p3)  ;;  %s613_s14 = smov (!%p189_p3), 96  }
   0x8   : > { %v556_v5 = vpack.c.bf16 (!%p189_p3), %v266_v4, %v265_v2  ;;  %v560_v8 = vpack.c.bf16 (!%p189_p3), %v268_v7, %v267_v6  ;;  %v523_v11 = vld [vmem:[%s698_s2] ss:$0 sm:$0xff] (!%p189_p3) }
   0x9   : > { %553 = vmatprep.subr.bf16.mxu0 (!%p189_p3), %v552_v3 }
   0xa   : > { %555 = vmatpush3.bf16.msra.mxu0 (!%p189_p3), %v552_v3 }
   0xb   : > { %557 = vmatprep.subr.bf16.mxu0 (!%p189_p3), %v556_v5 }
   0xe   : > { %s706_s15 = smov (!%p232_p4, %s603_s15), 1  ;;  %559 = vmatpush3.bf16.msra.mxu0 %v556_v5 }
   0xf   : > { %s526_s5 = sshll.u32 %s706_s15, 4  ;;  %561 = vmatprep.subr.bf16.mxu0 %v560_v8 }
  0x10   : > { %s239_s8 = scalar_lea.vmem %s696_s0, %s526_s5  ;;  %s249_s13 = scalar_lea.vmem %s699_s3, %s526_s5 }
  0x11   : > { %v261_v9 = vld [vmem:[%s239_s8] sm:$0xff]  ;;  %v262_v10 = vld [vmem:[%s239_s8 + $0x8] sm:$0xff]  ;;  %s259_s20 = scalar_lea.vmem %s700_s4, %s526_s5 }
  0x12   : > { %549 = vmatprep.mubr.msk.f32.mxu0 %vm269_vm0, %v261_v9  ;;  %563 = vmatpush3.bf16.msra.mxu0 %v560_v8 }
  0x15   : > { %550 = vmatmul.mubr.msk.f32.vlgmr.msra.gmra.mrb[0].mxu0 %vm269_vm0, %v262_v10 }
  0xe8   : > { %v551_v12 = vpop.f32.mrb[0].mxu0 }
  0xe9   : > { %v342_v13 = vpop.f32.mrb[1].mxu0  ;;  %v359_v14 = vadd.f32 %v551_v12, %v523_v11 }
  0xea   : > { %v358_v15 = vadd.f32 %v523_v11, %v342_v13  ;;  %365 = vrot.lane.b32.xlu0 %v342_v13, %s613_s14 }
  0xeb   : > { %362 = vst.msk [vmem:[%s249_s13 + $0x8] sm:$0xff] %vm360_vm1, %v359_v14 }
  0xec   : > { %361 = vst.msk [vmem:[%s249_s13] sm:$0xff] %vm360_vm1, %v358_v15 }
  0xee   : > { %367 = vrot.lane.b32.xlu0 %v551_v12, %s613_s14 }
 0x15c   : > { %v366_v16 = vpop.permute.xlu0 %365 }
 0x15d   : > { %371 = vst.msk [vmem:[%s259_s20] sm:$0xff] %vm360_vm1, %v366_v16 }
 0x160   : > { %v368_v17 = vpop.permute.xlu0 %367 }
 0x161   : > { %372 = vst.msk [vmem:[%s259_s20 + $0x8] sm:$0xff] %vm360_vm1, %v368_v17 }
 0x162 PF: > { %s15_s17 = sadd.s32 1, %s611_s17   ;;  %s701_s15 = smov %s607_s16 }
 0x163   : > { %p12_p5 = scmp.ge.s32.totalorder %s15_s17, 4   ;;  %s702_s16 = smov %s704_s18 }
 0x165   :  { %14 = sbr.rel (!%p12_p5) target bundleno = 2 (0x2), region = 74 }

// kernel: multihead_forward.3
= control target key start
LH: loop header
LB: loop body
LE: loop exit
PB: predicated region body
PF: predicated region fallthrough
CT: control target
= control target key end

     0   :  { %8 = vsyncpa [#allocation3], 0  ;;  %s1084_s0 = inlined_call_operand.vmem [shape: f32[2,16,32], index: 0, kind: input, shape index: {}]   ;;  %s1085_s1 = inlined_call_operand.vmem [shape: f32[2,2,1,256], index: 1, kind: input, shape index: {}]   ;;  %s1086_s2 = inlined_call_operand.vmem [shape: bf16[256,128], index: 2, kind: input, shape index: {}]   ;;  %s1087_s3 = inlined_call_operand.hbm [shape: f32[2,16,256], index: 3, kind: output, shape index: {}]  }
   0x1   :  { %10 = vsyncpa [#allocation3 + $0x1], 0  ;;  %s867_s12 = smov 0   ;;  %s869_s13 = smov 0  }
   0x2   :  { %s871_s14 = smov 0   ;;  %s873_s15 = smov 0  }
   0x3   :  { %s875_s16 = smov 0   ;;  %s877_s17 = smov 0  }
   0x4   :  { %s879_s18 = smov 0   ;;  %s881_s19 = smov 0  }
   0x5   :  { %s883_s20 = smov 0   ;;  %s885_s21 = smov 0  }
   0x6 LB: > { %1092 = sst [smem:[#allocation5_spill]] %s836_s20  ;;  %s564_s22 = sadd.s32 4294967295, %s840_s21   ;;  %s840_s21 = sphi %s885_s21, %s16_s21   ;;  %s836_s20 = sphi %s883_s20, %s1101_s20   ;;  %s832_s19 = sphi %s881_s19, %s1108_s19   ;;  %s828_s18 = sphi %s879_s18, %s1107_s18   ;;  %s824_s17 = sphi %s877_s17, %s1098_s17   ;;  %s820_s16 = sphi %s875_s16, %s1106_s16   ;;  %s816_s15 = sphi %s873_s15, %s1105_s15   ;;  %s812_s14 = sphi %s871_s14, %s1104_s14   ;;  %s808_s13 = sphi %s869_s13, %s1103_s13   ;;  %s804_s12 = sphi %s867_s12, %s1102_s12  }
   0x7   : > { %s28_s23 = sadd.s32 1, %s828_s18  ;;  %s31_s24 = sadd.s32 1, %s832_s19 }
   0x8   : > { %p29_p0 = scmp.ge.s32.totalorder %s28_s23, 2  ;;  %s565_s25 = sadd.s32 4294967294, %s840_s21  }
   0x9   : > { %p133_p1 = scmp.ne.s32.totalorder %s812_s14, %s808_s13  ;;  %s35_s26 = sadd.s32 1, %s836_s20 }
   0xa   : > { %s1110_s23 = smov (%p29_p0, %s28_s23), 0  ;;  %s1112_s24 = smov (!%p29_p0, %s31_s24), %s832_s19 }
   0xb   : > { %1093 = sst [smem:[#allocation6_spill]] %s1110_s23  ;;  %p134_p2 = scmp.eq.s32.totalorder %s564_s22, 7 }
   0xc   : > { %p33_p3 = scmp.ge.s32.totalorder %s1112_s24, 2  ;;  %p139_p4 = scmp.ne.s32.totalorder %s808_s13, %s804_s12 }
   0xd   : > { %p929_p5 = por %p134_p2, %p133_p1  ;;  %p140_p6 = scmp.eq.s32.totalorder %s565_s25, 7 }
   0xe   : > { %s1114_s24 = smov (%p33_p3, %s1112_s24), 0  ;;  %s1116_s26 = smov (!%p33_p3, %s35_s26), %s836_s20 }
   0xf   : > { %1095 = sst [smem:[#allocation7_spill]] %s1114_s24  ;;  %p936_p7 = por %p140_p6, %p139_p4 }
  0x10   : > { %p37_p8 = scmp.ge.s32.totalorder %s1116_s26, 2  ;;  %p568_p9 = scmp.ge.s32.totalorder %s840_s21, 1 }
  0x11   : > { %s117_s29 = ssub.s32 %s832_s19, %s1114_s24  ;;  %p183_p10 = scmp.lt.s32.totalorder %s840_s21, 9 }
  0x12   : > { %s1118_s26 = smov (%p37_p8, %s1116_s26), 0  ;;  %s119_s30 = ssub.s32 %s828_s18, %s1110_s23 }
  0x13   : > { %1097 = sst [smem:[#allocation8_spill]] %s1118_s26  ;;  %p184_p11 = pnand %p568_p9, %p183_p10 }
  0x14   : > { %s116_s4 = ssub.s32 %s836_s20, %s1118_s26  ;;  %s123_s7 = sadd.s32 1, %s812_s14  ;;  %v710_v0 = vld [vmem:[%s1086_s2 + $0x40] sm:$0xff] (!%p184_p11)   ;;  %v712_v2 = vld [vmem:[%s1086_s2 + $0x48] sm:$0xff] (!%p184_p11)   ;;  %v714_v4 = vld [vmem:[%s1086_s2 + $0x50] sm:$0xff] (!%p184_p11)   ;;  %v254_v17 = vlaneseq (!%p184_p11)  ;;  %vm247_vm0 = vcmask (!%p184_p11), 261120   ;;  %vm249_vm1 = vcmask (!%p184_p11), 523264  }
  0x15   : > { %s118_s5 = sor.u32 %s117_s29, %s116_s4  ;;  %187 = sbr.rel (%p184_p11) target bundleno = 404 (0x194), region = 32  ;;  %v711_v1 = vld [vmem:[%s1086_s2] sm:$0xff] (!%p184_p11)   ;;  %597 = vmatprep.subr.bf16.mxu0 (!%p184_p11), %v710_v0  ;;  %v713_v3 = vld [vmem:[%s1086_s2 + $0x8] sm:$0xff] (!%p184_p11)   ;;  %v715_v5 = vld [vmem:[%s1086_s2 + $0x10] sm:$0xff] (!%p184_p11)   ;;  %vm251_vm2 = vcmask (!%p184_p11), 785408   ;;  %v845_v41 = vmov (!%p184_p11), 0.0  }
  0x16   : > { %s120_s6 = sor.u32 %s119_s30, %s118_s5  ;;  %p218_p13 = scmp.lt.s32.totalorder (!%p184_p11), %s824_s17, 1  ;;  %598 = vmatpush3.bf16.msra.mxu0 (!%p184_p11), %v711_v1  ;;  %v716_v7 = vld [vmem:[%s1086_s2 + $0x58] sm:$0xff] (!%p184_p11)   ;;  %v718_v9 = vld [vmem:[%s1086_s2 + $0x60] sm:$0xff] (!%p184_p11)   ;;  %v720_v11 = vld [vmem:[%s1086_s2 + $0x68] sm:$0xff] (!%p184_p11)   ;;  %v255_v18 = vshrl.u32 (!%p184_p11), %v254_v17, 7 }
  0x17   : > { %p121_p12 = scmp.eq.s32.totalorder %s120_s6, 0  ;;  %p220_p0 = scmp.lt.s32.totalorder (!%p184_p11), %s820_s16, 1  ;;  %599 = vmatprep.subr.bf16.mxu0 (!%p184_p11), %v712_v2  ;;  %v717_v8 = vld [vmem:[%s1086_s2 + $0x18] sm:$0xff] (!%p184_p11)   ;;  %v719_v10 = vld [vmem:[%s1086_s2 + $0x20] sm:$0xff] (!%p184_p11)   ;;  %v721_v12 = vld [vmem:[%s1086_s2 + $0x28] sm:$0xff] (!%p184_p11)  }
  0x18   : > { %s844_s23 = smov (!%p184_p11), 64   ;;  %v722_v13 = vld [vmem:[%s1086_s2 + $0x70] sm:$0xff] (!%p184_p11)   ;;  %v724_v15 = vld [vmem:[%s1086_s2 + $0x78] sm:$0xff] (!%p184_p11)   ;;  %p228_p1 = scmp.lt.s32.totalorder (!%p184_p11), %s816_s15, 1  ;;  %v256_v19 = vsub.s32 (!%p184_p11), 0, %v255_v18  ;;  %v260_v20 = vsub.s32 (!%p184_p11), 1, %v255_v18 }
  0x19   : > { %s952_s8 = scalar_select %p121_p12, %s812_s14, %s123_s7  }
  0x1a   : > { %600 = vmatpush3.bf16.msra.mxu0 (!%p184_p11), %v713_v3  ;;  %v723_v14 = vld [vmem:[%s1086_s2 + $0x30] sm:$0xff] (!%p184_p11)   ;;  %v725_v16 = vld [vmem:[%s1086_s2 + $0x38] sm:$0xff] (!%p184_p11)  }
  0x1b   : > { %601 = vmatprep.subr.bf16.mxu0 (!%p184_p11), %v714_v4 }
  0x1c   : > { %s963_s25 = scalar_select %p218_p13, %s824_s17, 1 }
  0x1d   : > { %s221_s4 = scalar_select %p220_p0, %s820_s16, 1 }
  0x1e   : > { %s570_s5 = sshll.u32 %s963_s25, 1  ;;  %602 = vmatpush3.bf16.msra.mxu0 %v715_v5  ;;  %s573_s11 = sshll.u32 %s963_s25, 2 }
  0x1f   : > { %s223_s9 = sadd.s32 %s570_s5, %s221_s4  ;;  %s842_s4 = smov 32   ;;  %603 = vmatprep.subr.bf16.mxu0 %v716_v7 }
  0x20   : > { %s571_s10 = sshll.u32 %s223_s9, 3  ;;  %s843_s5 = smov 96  }
  0x21   : > { %s225_s29 = scalar_lea.vmem %s1084_s0, %s571_s10  ;;  %s215_s25 = sand.u32 1, %s808_s13  }
  0x22   : > { %v235_v6 = vld [vmem:[%s225_s29] sm:$0xff]  ;;  %604 = vmatpush3.bf16.msra.mxu0 %v717_v8  ;;  %s229_s20 = scalar_select %p228_p1, %s816_s15, 1 }
  0x23   : > { %238 = vrot.lane.b32.xlu0 %v235_v6, %s842_s4  ;;  %244 = vrot.lane.b32.xlu1 %v235_v6, %s843_s5  ;;  %s592_s4 = sshll.u32 %s820_s16, 1  ;;  %s569_s5 = sshll.u32 %s215_s25, 3 }
  0x24   : > { %605 = vmatprep.subr.bf16.mxu0 %v718_v9  ;;  %s572_s10 = sshll.u32 %s229_s20, 1  ;;  %s454_s7 = sadd.s32 %s816_s15, %s592_s4 }
  0x25   : > { %s232_s22 = sadd.s32 %s573_s11, %s572_s10  ;;  %s593_s9 = sshll.u32 %s824_s17, 2 }
  0x26   : > { %606 = vmatpush3.bf16.msra.mxu0 %v719_v10  ;;  %s233_s6 = scalar_lea.vmem %s1085_s1, %s232_s22  ;;  %s456_s24 = sadd.s32 %s593_s9, %s454_s7 }
  0x27   : > { %241 = vrot.lane.b32.xlu0 %v235_v6, %s844_s23  ;;  %607 = vmatprep.subr.bf16.mxu0 %v720_v11  ;;  %v236_v22 = vld [vmem:[%s233_s6] sm:$0x3]  ;;  %s594_s26 = sshll.u32 %s456_s24, 7  ;;  %s217_s23 = scalar_lea.vmem [#allocation2], %s569_s5 }
  0x28   : > { %v257_v23 = vrot.slane %v236_v22, %v256_v19  ;;  %v261_v24 = vrot.slane %v236_v22, %v260_v20  ;;  %s460_s20 = sshll.u32 %s217_s23, 4  ;;  %s1025_s22 = scalar_lea.hbm %s1087_s3, %s594_s26  ;;  %s1027_s20 = int_to_ptr.vmem [resolvable:$true] %s460_s20 }
  0x29   : > { %s443_s15 = scalar_lea.sflag [#allocation3], %s215_s25  ;;  %s730_s16 = scalar_lea.vmem %s1027_s20, 128 }
  0x2a   : > { %608 = vmatpush3.bf16.msra.mxu0 %v721_v12  ;;  %p731_p2 = scmp.ne.s32.totalorder %s1027_s20, %s730_s16  ;;  %s846_s17 = smov [#allocation2]  }
  0x2b   : > { %609 = vmatprep.subr.bf16.mxu0 %v722_v13  ;;  %s734_s29 = sshll.u32 %s846_s17, 4  ;;  %s735_s29 = int_to_ptr.vmem [resolvable:$false] %s734_s29 }
  0x2c   : > { %p732_p3 = pnand %p731_p2, %p929_p5  ;;  %s736_s30 = scalar_lea.vmem %s735_s29, 256 }
  0x2d   : > { %p737_p6 = scmp.lt.s32.totalorder %s1027_s20, %s735_s29  ;;  %p738_p8 = scmp.lt.s32.totalorder %s736_s30, %s730_s16 }
  0x2e   : > { %610 = vmatpush3.bf16.msra.mxu0 %v723_v14  ;;  %p733_p4 = pneg %p732_p3 }
  0x2f   : > { %611 = vmatprep.subr.bf16.mxu0 %v724_v15  ;;  %p739_p9 = por %p738_p8, %p737_p6 }
  0x31   : > { %p740_p10 = pnand %p739_p9, %p733_p4 }
  0x32   : > { %612 = vmatpush3.bf16.msra.mxu0 %v725_v16 }
  0x95   : > { %v239_v21 = vpop.permute.xlu0 %238  ;;  %v245_v25 = vpop.permute.xlu1 %244 }
  0x96   : > { %v248_v26 = vsel %vm247_vm0, %v235_v6, %v239_v21 }
  0x99   : > { %v242_v27 = vpop.permute.xlu0 %241 }
  0x9a   : > { %v250_v28 = vsel %vm249_vm1, %v248_v26, %v242_v27 }
  0x9b   : > { %v252_v29 = vsel %vm251_vm2, %v250_v28, %v245_v25 }
  0x9c   : > { %v264_v30 = vadd.f32 %v257_v23, %v252_v29  ;;  %v265_v31 = vadd.f32 %v261_v24, %v252_v29 }
  0x9e   : > { %726 = vtanh.f32 %v264_v30 }
  0x9f   : > { %728 = vtanh.f32 %v265_v31 }
  0xa8   : > { %v727_v32 = vpop.eup %726 }
  0xa9   : > { %v729_v33 = vpop.eup %728  ;;  %v268_v34 = vpack.c.bf16 %v727_v32, %v727_v32 }
  0xaa   : > { %v269_v35 = vpack.c.bf16 %v729_v33, %v729_v33 }
  0xac   : > { %430 = vmatprep.mubr.bf16.mxu0 %v269_v35 }
  0xad   : > { %431 = vmatmul.mubr.bf16.vlgmr.msra.gmra.mrb[0].mxu0 %v268_v34 }
 0x180   : > { %v613_v36 = vpop.f32.mrb[0].mxu0 }
 0x181   : > { %v614_v37 = vpop.f32.mrb[1].mxu0 }
 0x182   : > { %v615_v38 = vadd.f32 %v614_v37, %v613_v36  ;;  %v616_v39 = vpop.f32.mrb[2].mxu0 }
 0x183   : > { %v617_v40 = vpop.f32.mrb[3].mxu0 }
 0x184   : > { %vm438_vm3 = vcmp.gt.f32.partialorder %v615_v38, 0.0 }
 0x185   : > { %v590_v42 = vsel %vm438_vm3, 1.0, %v845_v41 }
 0x186   : > { %441 = vst [vmem:[%s217_s23] sm:$0xff] %v590_v42 }
 0x187   : > { %743 = shalt.err (!%p740_p10)
}
 0x188   : > { %s744_s6 = scalar_lea.hbm %s1025_s22, 128  ;;  %s748_s5 = scalar_lea.hbm %s1087_s3, 1024 }
 0x189   : > { %p745_p11 = scmp.ne.s32.totalorder %s1025_s22, %s744_s6  ;;  %p749_p0 = scmp.lt.u32.totalorder %s1025_s22, %s1087_s3 }
 0x18a   : > { %p750_p1 = scmp.lt.u32.totalorder %s748_s5, %s744_s6  ;;  %p752_p3 = scmp.lt.u32.totalorder %s744_s6, %s1025_s22 }
 0x18b   : > { %p746_p12 = pnand %p745_p11, %p929_p5 }
 0x18c   : > { %p751_p2 = por %p750_p1, %p749_p0 }
 0x18d   : > { %p747_p13 = pneg %p746_p12 }
 0x18e   : > { %p753_p4 = por %p752_p3, %p751_p2 }
 0x190   : > { %p754_p6 = pnand %p753_p4, %p747_p13 }
 0x192   : > { %757 = shalt.err (!%p754_p6)
}
 0x193   : > { %619 = dma.vmem_to_hbm [thread:$0]  (%p929_p5), %s1027_s20, 128, %s1025_s22, %s443_s15  }
 0x194 PF: > { %p625_p8 = scmp.ge.s32.totalorder %s840_s21, 2  ;;  %s472_s24 = sand.u32 1, %s804_s12  }
 0x195   : > { %s473_s26 = scalar_lea.sflag [#allocation3], %s472_s24 }
 0x196   : > { %p622_p9 = pnand %p625_p8, %p936_p7 }
 0x198   : > { %799 = dma.done.wait (!%p622_p9), %s473_s26, 128  }
 0x199   : > { %801 = vsyncadd (!%p622_p9), %s473_s26, 4294967168  ;;  %s16_s21 = sadd.s32 1, %s840_s21   ;;  %s1098_s17 = sld [smem:[#allocation5_spill]] }
 0x19a   : > { %p13_p10 = scmp.ge.s32.totalorder %s16_s21, 10   ;;  %s1099_s27 = sld [smem:[#allocation6_spill]] }
 0x19b   : > { %s1100_s23 = sld [smem:[#allocation7_spill]]  ;;  %s1101_s20 = sld [smem:[#allocation8_spill]] }
 0x19c   : > { %s1102_s12 = smov %s808_s13  ;;  %s1103_s13 = smov %s812_s14 }
 0x19d   : > { %s1104_s14 = smov %s952_s8  ;;  %s1105_s15 = smov %s828_s18 }
 0x19e   : > { %s1106_s16 = smov %s832_s19  ;;  %15 = sbr.rel (!%p13_p10) target bundleno = 6 (0x6), region = 70 }
 0x1a0   : > { %s1107_s18 = smov %s1099_s27 }
 0x1a1   : > { %s1108_s19 = smov %s1100_s23 }
 0x1a5   :  { %478 = vsyncpa [#allocation3], 1 }
 0x1a6   :  { %480 = vsyncpa [#allocation3 + $0x1], 1 }

</bundles_post_ra>
